<compile_context>
chip_gen: v7x
topology: tpu7x:2x2x1
jax: 0.10.0
libtpu: 0.0.40
codegen_flags: <defaults>
</compile_context>

<pallas_src>
import functools

import jax
import jax.numpy as jnp
from jax import lax
from jax.experimental import pallas as pl
from jax.experimental.pallas import tpu as pltpu


def _afa_fused_kernel(x1_ref, x2_ref, mA_ref, mB_ref, td_ref, o1_ref, o2_ref):
    # One batch element per grid step; batch dim is squeezed -> refs are (C, HW).
    x1 = x1_ref[...]                                   # (C, HW)
    x2 = x2_ref[...]

    # Channel sums (1/C is pre-folded into mA/mB), cross-sublane reduce (XLU).
    sA = jnp.sum(x1, axis=0, keepdims=True)            # (1, HW)
    sB = jnp.sum(x2, axis=0, keepdims=True)            # (1, HW)

    # 7x7 "same" conv on cat([dA, dB]) lowered to dense matmuls (MXU) + ReLU.
    g = jnp.dot(sA, mA_ref[...], preferred_element_type=jnp.float32)
    g = g + jnp.dot(sB, mB_ref[...], preferred_element_type=jnp.float32)
    g = jnp.maximum(g, 0.0)                            # (1, HW)

    # Pairwise softmax collapses to a sigmoid of the logit difference:
    #   w_self = e^{g1} / (e^{g1} + e^{g2}) = sigmoid(g @ (t1 - t2)^T)
    d = jnp.dot(g, td_ref[...], preferred_element_type=jnp.float32)   # (1, HW)
    ws = 1.0 / (1.0 + jnp.exp(-d))                     # (1, HW)

    # w_other = 1 - w_self  =>  single multiply per element, fused with ReLU.
    t = ws * (x1 - x2)                                 # broadcast over channels
    o1_ref[...] = jnp.maximum(x2 + t, 0.0)             # relu(w_self*x1 + w_other*x2)
    o2_ref[...] = jnp.maximum(x1 - t, 0.0)             # relu(w_self*x2 + w_other*x1)


def afa_layer_sam(x1, x2, conv_w, t1_w, t2_w):
    """x1, x2: (B, C, H, W) float32 (NCHW).
    conv_w: (1, 2, kh, kw) Conv2d weight (no bias).
    t1_w, t2_w: (H*W, H*W) PyTorch Linear weights (out, in), no bias.
    Returns (out1, out2), each (B, C, H, W)."""
    B, C, H, W = x1.shape
    HW = H * W
    assert t1_w.shape == (HW, HW) and t2_w.shape == (HW, HW)
    assert conv_w.shape[0] == 1 and conv_w.shape[1] == 2

    x1f = x1.reshape(B, C, HW).astype(jnp.float32)
    x2f = x2.reshape(B, C, HW).astype(jnp.float32)

    # ---- weight-only precompute (plain JAX glue, parameters only) ----------
    # Lower the k x k "same" conv to a dense matrix M (2*HW, HW) such that
    # conv(dcat).flatten() == dcat.flatten() @ M   (dcat = cat([dA, dB], ch)).
    kh, kw = int(conv_w.shape[2]), int(conv_w.shape[3])
    ph, pw = (kh - 1) // 2, (kw - 1) // 2
    basis = jnp.eye(2 * HW, dtype=jnp.float32).reshape(2 * HW, 2, H, W)
    M = lax.conv_general_dilated(
        basis, conv_w.astype(jnp.float32),
        window_strides=(1, 1), padding=((ph, ph), (pw, pw)),
        dimension_numbers=("NCHW", "OIHW", "NCHW")).reshape(2 * HW, HW)
    inv_c = 1.0 / float(C)
    mA = (M[:HW] * inv_c).astype(jnp.float32)          # applied to sum(x1, ch)
    mB = (M[HW:] * inv_c).astype(jnp.float32)          # applied to sum(x2, ch)
    # softmax(pair) => sigmoid(g1 - g2) = sigmoid(g @ (t1 - t2)^T)
    tdiff = jnp.transpose(t1_w.astype(jnp.float32) - t2_w.astype(jnp.float32))

    # ---- VMEM budget: x1+x2+o1+o2 blocks, double-buffered, + weights --------
    block_bytes = 4 * C * HW * 4
    vmem_limit = int(min(100 * 1024 * 1024,
                         max(32 * 1024 * 1024,
                             2 * block_bytes + 3 * HW * HW * 4 + 4 * 1024 * 1024)))

    o1, o2 = pl.pallas_call(
        _afa_fused_kernel,
        grid=(B,),
        in_specs=[
            pl.BlockSpec((None, C, HW), lambda b: (b, 0, 0)),
            pl.BlockSpec((None, C, HW), lambda b: (b, 0, 0)),
            pl.BlockSpec((HW, HW), lambda b: (0, 0)),
            pl.BlockSpec((HW, HW), lambda b: (0, 0)),
            pl.BlockSpec((HW, HW), lambda b: (0, 0)),
        ],
        out_specs=(pl.BlockSpec((None, C, HW), lambda b: (b, 0, 0)),
                   pl.BlockSpec((None, C, HW), lambda b: (b, 0, 0))),
        out_shape=(jax.ShapeDtypeStruct((B, C, HW), jnp.float32),
                   jax.ShapeDtypeStruct((B, C, HW), jnp.float32)),
        compiler_params=pltpu.CompilerParams(
            dimension_semantics=("parallel",),
            vmem_limit_bytes=vmem_limit),
    )(x1f, x2f, mA, mB, tdiff)

    return o1.reshape(B, C, H, W), o2.reshape(B, C, H, W)


def _reference(x1, x2, conv_w, t1_w, t2_w):
    # Pure-JAX reference of the PyTorch AFA_layer_sam forward.
    B, C, H, W = x1.shape
    dA = jnp.mean(x1, axis=1, keepdims=True)
    dB = jnp.mean(x2, axis=1, keepdims=True)
    dcat = jnp.concatenate([dA, dB], axis=1)
    kh, kw = int(conv_w.shape[2]), int(conv_w.shape[3])
    ph, pw = (kh - 1) // 2, (kw - 1) // 2
    g = lax.conv_general_dilated(dcat, conv_w, (1, 1), ((ph, ph), (pw, pw)),
                                 dimension_numbers=("NCHW", "OIHW", "NCHW"))
    g = jax.nn.relu(g).reshape(B, H * W)
    g1 = g @ t1_w.T
    g2 = g @ t2_w.T
    w = jax.nn.softmax(jnp.stack([g1, g2], axis=1), axis=1)
    w_self = w[:, 0].reshape(B, 1, H, W)
    w_other = w[:, 1].reshape(B, 1, H, W)
    out1 = w_self * x1 + w_other * x2
    out2 = w_self * x2 + w_other * x1
    return jax.nn.relu(out1), jax.nn.relu(out2)


if __name__ == "__main__":
    # AFA_layer_sam(h=7, w=7): spatial maps are 7x7, so HW = 49 (fixed by the
    # module's Linear layers). Small deterministic test shapes.
    B, C, H, W = 2, 32, 7, 7
    HW = H * W

    key = jax.random.PRNGKey(0)
    k1, k2, k3, k4, k5 = jax.random.split(key, 5)
    x1 = jax.random.normal(k1, (B, C, H, W), dtype=jnp.float32)
    x2 = jax.random.normal(k2, (B, C, H, W), dtype=jnp.float32)
    conv_w = 0.1 * jax.random.normal(k3, (1, 2, 7, 7), dtype=jnp.float32)
    t1_w = 0.1 * jax.random.normal(k4, (HW, HW), dtype=jnp.float32)
    t2_w = 0.1 * jax.random.normal(k5, (HW, HW), dtype=jnp.float32)

    out1, out2 = afa_layer_sam(x1, x2, conv_w, t1_w, t2_w)
    jax.block_until_ready((out1, out2))

    r1, r2 = _reference(x1, x2, conv_w, t1_w, t2_w)
    assert jnp.allclose(out1, r1, atol=1e-5, rtol=1e-5), \
        float(jnp.max(jnp.abs(out1 - r1)))
    assert jnp.allclose(out2, r2, atol=1e-5, rtol=1e-5), \
        float(jnp.max(jnp.abs(out2 - r2)))
    print("KERNEL_OK")
</pallas_src>

<mosaic_0001>
module attributes {stable_mosaic.version = 11 : i64} {
  func.func @_afa_fused_kernel(%arg0: i32, %arg1: memref<1x32x49xf32, #tpu.memory_space<vmem>>, %arg2: memref<1x32x49xf32, #tpu.memory_space<vmem>>, %arg3: memref<49x49xf32, #tpu.memory_space<vmem>>, %arg4: memref<49x49xf32, #tpu.memory_space<vmem>>, %arg5: memref<49x49xf32, #tpu.memory_space<vmem>>, %arg6: memref<1x32x49xf32, #tpu.memory_space<vmem>>, %arg7: memref<1x32x49xf32, #tpu.memory_space<vmem>>) attributes {dimension_semantics = [#tpu.dimension_semantics<parallel>], iteration_bounds = array<i64: 2>, scalar_prefetch = 0 : i64, scratch_operands = 0 : i64, tpu.core_type = #tpu.core_type<tc>, window_params = [{transform_indices = @transform_0, window_bounds = array<i64: 1, 32, 49>}, {transform_indices = @transform_1, window_bounds = array<i64: 1, 32, 49>}, {pipeline_mode = #tpu.pipeline_mode<synchronous>, transform_indices = @transform_2, window_bounds = array<i64: 49, 49>}, {pipeline_mode = #tpu.pipeline_mode<synchronous>, transform_indices = @transform_3, window_bounds = array<i64: 49, 49>}, {pipeline_mode = #tpu.pipeline_mode<synchronous>, transform_indices = @transform_4, window_bounds = array<i64: 49, 49>}, {transform_indices = @transform_5, window_bounds = array<i64: 1, 32, 49>}, {transform_indices = @transform_6, window_bounds = array<i64: 1, 32, 49>}]} {
    %c0 = arith.constant 0 : index
    %c0_0 = arith.constant 0 : index
    %c0_1 = arith.constant 0 : index
    %0 = vector.load %arg1[%c0, %c0_0, %c0_1] : memref<1x32x49xf32, #tpu.memory_space<vmem>>, vector<1x32x49xf32>
    %1 = vector.shape_cast %0 : vector<1x32x49xf32> to vector<32x49xf32>
    %c0_2 = arith.constant 0 : index
    %c0_3 = arith.constant 0 : index
    %c0_4 = arith.constant 0 : index
    %2 = vector.load %arg2[%c0_2, %c0_3, %c0_4] : memref<1x32x49xf32, #tpu.memory_space<vmem>>, vector<1x32x49xf32>
    %3 = vector.shape_cast %2 : vector<1x32x49xf32> to vector<32x49xf32>
    %cst = arith.constant dense<0.000000e+00> : vector<49xf32>
    %4 = vector.multi_reduction <add>, %1, %cst [0] : vector<32x49xf32> to vector<49xf32>
    %5 = vector.shape_cast %4 : vector<49xf32> to vector<1x49xf32>
    %cst_5 = arith.constant dense<0.000000e+00> : vector<49xf32>
    %6 = vector.multi_reduction <add>, %3, %cst_5 [0] : vector<32x49xf32> to vector<49xf32>
    %7 = vector.shape_cast %6 : vector<49xf32> to vector<1x49xf32>
    %c0_6 = arith.constant 0 : index
    %c0_7 = arith.constant 0 : index
    %8 = vector.load %arg3[%c0_6, %c0_7] : memref<49x49xf32, #tpu.memory_space<vmem>>, vector<49x49xf32>
    %cst_8 = arith.constant dense<0.000000e+00> : vector<1x49xf32>
    %9 = tpu.matmul %5, %8, %cst_8 {dimension_numbers = #tpu.dot_dimension_numbers<[1], [0], [0], [1], [0, 0, 1, 1], [], []>} : vector<1x49xf32>, vector<49x49xf32>, vector<1x49xf32> -> vector<1x49xf32>
    %c0_9 = arith.constant 0 : index
    %c0_10 = arith.constant 0 : index
    %10 = vector.load %arg4[%c0_9, %c0_10] : memref<49x49xf32, #tpu.memory_space<vmem>>, vector<49x49xf32>
    %cst_11 = arith.constant dense<0.000000e+00> : vector<1x49xf32>
    %11 = tpu.matmul %7, %10, %cst_11 {dimension_numbers = #tpu.dot_dimension_numbers<[1], [0], [0], [1], [0, 0, 1, 1], [], []>} : vector<1x49xf32>, vector<49x49xf32>, vector<1x49xf32> -> vector<1x49xf32>
    %12 = arith.addf %9, %11 : vector<1x49xf32>
    %cst_12 = arith.constant 0.000000e+00 : f32
    %13 = vector.broadcast %cst_12 : f32 to vector<1x49xf32>
    %14 = arith.maximumf %12, %13 : vector<1x49xf32>
    %c0_13 = arith.constant 0 : index
    %c0_14 = arith.constant 0 : index
    %15 = vector.load %arg5[%c0_13, %c0_14] : memref<49x49xf32, #tpu.memory_space<vmem>>, vector<49x49xf32>
    %cst_15 = arith.constant dense<0.000000e+00> : vector<1x49xf32>
    %16 = tpu.matmul %14, %15, %cst_15 {dimension_numbers = #tpu.dot_dimension_numbers<[1], [0], [0], [1], [0, 0, 1, 1], [], []>} : vector<1x49xf32>, vector<49x49xf32>, vector<1x49xf32> -> vector<1x49xf32>
    %cst_16 = arith.constant 0.000000e+00 : f32
    %17 = vector.broadcast %cst_16 : f32 to vector<1x49xf32>
    %18 = arith.subf %17, %16 : vector<1x49xf32>
    %19 = math.exp %18 : vector<1x49xf32>
    %cst_17 = arith.constant 1.000000e+00 : f32
    %20 = vector.broadcast %cst_17 : f32 to vector<1x49xf32>
    %21 = arith.addf %20, %19 : vector<1x49xf32>
    %cst_18 = arith.constant 1.000000e+00 : f32
    %22 = vector.broadcast %cst_18 : f32 to vector<1x49xf32>
    %23 = arith.divf %22, %21 : vector<1x49xf32>
    %24 = arith.subf %1, %3 : vector<32x49xf32>
    %25 = vector.broadcast %23 : vector<1x49xf32> to vector<32x49xf32>
    %26 = arith.mulf %25, %24 : vector<32x49xf32>
    %27 = arith.addf %3, %26 : vector<32x49xf32>
    %cst_19 = arith.constant 0.000000e+00 : f32
    %28 = vector.broadcast %cst_19 : f32 to vector<32x49xf32>
    %29 = arith.maximumf %27, %28 : vector<32x49xf32>
    %c0_20 = arith.constant 0 : index
    %c0_21 = arith.constant 0 : index
    %c0_22 = arith.constant 0 : index
    %30 = vector.load %arg6[%c0_20, %c0_21, %c0_22] : memref<1x32x49xf32, #tpu.memory_space<vmem>>, vector<1x32x49xf32>
    %31 = vector.shape_cast %30 : vector<1x32x49xf32> to vector<32x49xf32>
    %32 = vector.shape_cast %29 : vector<32x49xf32> to vector<1x32x49xf32>
    tpu.vector_store %arg6[%c0_20, %c0_21, %c0_22], %32 {strides = array<i32>} : memref<1x32x49xf32, #tpu.memory_space<vmem>>, vector<1x32x49xf32>,
    %33 = arith.subf %1, %26 : vector<32x49xf32>
    %cst_23 = arith.constant 0.000000e+00 : f32
    %34 = vector.broadcast %cst_23 : f32 to vector<32x49xf32>
    %35 = arith.maximumf %33, %34 : vector<32x49xf32>
    %c0_24 = arith.constant 0 : index
    %c0_25 = arith.constant 0 : index
    %c0_26 = arith.constant 0 : index
    %36 = vector.load %arg7[%c0_24, %c0_25, %c0_26] : memref<1x32x49xf32, #tpu.memory_space<vmem>>, vector<1x32x49xf32>
    %37 = vector.shape_cast %36 : vector<1x32x49xf32> to vector<32x49xf32>
    %38 = vector.shape_cast %35 : vector<32x49xf32> to vector<1x32x49xf32>
    tpu.vector_store %arg7[%c0_24, %c0_25, %c0_26], %38 {strides = array<i32>} : memref<1x32x49xf32, #tpu.memory_space<vmem>>, vector<1x32x49xf32>,
    return
  }
  func.func @transform_0(%arg0: i32) -> (i32, i32, i32) {
    %c0_i32 = arith.constant 0 : i32
    %c0_i32_0 = arith.constant 0 : i32
    %c0_i32_1 = arith.constant 0 : i32
    return %arg0, %c0_i32, %c0_i32_0 : i32, i32, i32
  }
  func.func @transform_1(%arg0: i32) -> (i32, i32, i32) {
    %c0_i32 = arith.constant 0 : i32
    %c0_i32_0 = arith.constant 0 : i32
    %c0_i32_1 = arith.constant 0 : i32
    return %arg0, %c0_i32, %c0_i32_0 : i32, i32, i32
  }
  func.func @transform_2(%arg0: i32) -> (i32, i32) {
    %c0_i32 = arith.constant 0 : i32
    %c0_i32_0 = arith.constant 0 : i32
    %c0_i32_1 = arith.constant 0 : i32
    return %c0_i32, %c0_i32_0 : i32, i32
  }
  func.func @transform_3(%arg0: i32) -> (i32, i32) {
    %c0_i32 = arith.constant 0 : i32
    %c0_i32_0 = arith.constant 0 : i32
    %c0_i32_1 = arith.constant 0 : i32
    return %c0_i32, %c0_i32_0 : i32, i32
  }
  func.func @transform_4(%arg0: i32) -> (i32, i32) {
    %c0_i32 = arith.constant 0 : i32
    %c0_i32_0 = arith.constant 0 : i32
    %c0_i32_1 = arith.constant 0 : i32
    return %c0_i32, %c0_i32_0 : i32, i32
  }
  func.func @transform_5(%arg0: i32) -> (i32, i32, i32) {
    %c0_i32 = arith.constant 0 : i32
    %c0_i32_0 = arith.constant 0 : i32
    %c0_i32_1 = arith.constant 0 : i32
    return %arg0, %c0_i32, %c0_i32_0 : i32, i32, i32
  }
  func.func @transform_6(%arg0: i32) -> (i32, i32, i32) {
    %c0_i32 = arith.constant 0 : i32
    %c0_i32_0 = arith.constant 0 : i32
    %c0_i32_1 = arith.constant 0 : i32
    return %arg0, %c0_i32, %c0_i32_0 : i32, i32, i32
  }
}

</mosaic_0001>

<bundles_post_ra>
// kernel: tpu_custom_call.1
= control target key start
LH: loop header
LB: loop body
LE: loop exit
PB: predicated region body
PF: predicated region fallthrough
CT: control target
= control target key end

     0   :  { %s1887_s0 = inlined_call_operand.hbm [shape: f32[2,32,49], index: 0, kind: input, shape index: {}]   ;;  %s1888_s1 = inlined_call_operand.hbm [shape: f32[2,32,49], index: 1, kind: input, shape index: {}]   ;;  %s1889_s2 = inlined_call_operand.hbm [shape: f32[49,49], index: 2, kind: input, shape index: {}]   ;;  %s1890_s3 = inlined_call_operand.hbm [shape: f32[49,49], index: 3, kind: input, shape index: {}]   ;;  %s1891_s4 = inlined_call_operand.hbm [shape: f32[49,49], index: 4, kind: input, shape index: {}]   ;;  %s1892_s5 = inlined_call_operand.hbm [shape: f32[2,32,49], index: 5, kind: output, shape index: {0}]   ;;  %s1893_s6 = inlined_call_operand.hbm [shape: f32[2,32,49], index: 6, kind: output, shape index: {1}]  }
   0x1   :  { %1901 = sst [smem:[#allocation21_spill]] %s1887_s0 }
   0x2   :  { %1902 = sst [smem:[#allocation22_spill]] %s1889_s2 }
   0x3   :  { %1903 = sst [smem:[#allocation23_spill]] %s1890_s3 }
   0x4   :  { %1904 = sst [smem:[#allocation24_spill]] %s1891_s4 }
   0x5   :  { %12 = vsyncpa [#allocation3], 0 }
   0x6   :  { %14 = vsyncpa [#allocation3 + $0x1], 0 }
   0x7   :  { %15 = vsyncpa [#allocation6], 0 }
   0x8   :  { %17 = vsyncpa [#allocation6 + $0x1], 0 }
   0x9   :  { %18 = vsyncpa [#allocation9], 0 }
   0xa   :  { %19 = vsyncpa [#allocation4], 0 }
   0xb   :  { %21 = vsyncpa [#allocation4 + $0x1], 0 }
   0xc   :  { %22 = vsyncpa [#allocation13], 0 }
   0xd   :  { %24 = vsyncpa [#allocation13 + $0x1], 0  ;;  %s1428_s21 = smov 0   ;;  %s1430_s22 = smov 0  }
   0xe   :  { %s1432_s23 = smov 0   ;;  %s1434_s24 = smov 0  }
   0xf LB: > { %s1449_s25 = sadd.s32 4294967295, %s1377_s24   ;;  %s883_s26 = sadd.s32 4294967294, %s1377_s24   ;;  %s1377_s24 = sphi %s1434_s24, %s1932_s24   ;;  %s1373_s23 = sphi %s1432_s23, %s1931_s23   ;;  %s1369_s22 = sphi %s1430_s22, %s1930_s22   ;;  %s1365_s21 = sphi %s1428_s21, %s1929_s21  }
  0x10   : > { %p50_p0 = scmp.ne.s32.totalorder %s1369_s22, %s1365_s21  ;;  %p1894_p1 = scmp.eq.s32.totalorder %s1449_s25, 0 }
  0x11   : > { %p169_p3 = scmp.eq.s32.totalorder %s883_s26, 1  ;;  %p884_p5 = scmp.ge.s32.totalorder %s1377_s24, 1 }
  0x12   : > { %p1458_p4 = por %p1894_p1, %p50_p0  ;;  %p202_p7 = scmp.lt.s32.totalorder %s1377_s24, 3 }
  0x13   : > { %p1463_p6 = por %p169_p3, %p50_p0  ;;  %s1379_s30 = smov [#allocation7]  }
  0x14   : > { %s1905_s27 = scalar_select %p1458_p4, 1, 0 }
  0x15   : > { %s1906_s28 = scalar_select %p1463_p6, 1, 0 }
  0x16   : > { %p1468_p8 = pnand %p884_p5, %p202_p7  ;;  %s214_s7 = sshll.u32 %s1379_s30, 4  ;;  %s1472_s7 = int_to_ptr.vmem [resolvable:$true] %s214_s7 }
  0x17   : > { %s1380_s9 = smov [#allocation8]   ;;  %s1381_s11 = smov [#allocation10]  }
  0x18   : > { %s1907_s29 = scalar_select %p1468_p8, 1, 0 }
  0x19   : > { %p1045_p9 = pneg %p1468_p8  ;;  %s227_s10 = sshll.u32 %s1380_s9, 4  ;;  %s1483_s10 = int_to_ptr.vmem [resolvable:$true] %s227_s10 }
  0x1a   : > { %s1485_s12 = sshll.u32 %s1381_s11, 4  ;;  %s1909_s2 = sld [smem:[#allocation22_spill]]  ;;  %s241_s12 = int_to_ptr.vmem [resolvable:$true] %s1485_s12 }
  0x1b   : > { %p1479_p11 = pnand %p1045_p9, %p1894_p1 }
  0x1d   : > { %p1495_p13 = pneg %p1479_p11 }
  0x20   : > { %s1123_s15 = scalar_lea.hbm %s1909_s2, 896 }
  0x21   : > { %p1124_p12 = scmp.ne.s32.totalorder %s1909_s2, %s1123_s15  ;;  %p1130_p5 = scmp.lt.u32.totalorder %s1123_s15, %s1909_s2 }
  0x23   : > { %p1126_p0 = pnand %p1495_p13, %p1124_p12 }
  0x25   : > { %p1127_p3 = pneg %p1126_p0 }
  0x27   : > { %p1132_p7 = pnand %p1130_p5, %p1127_p3 }
  0x29   : > { %1135 = shalt.err (!%p1132_p7)
}
  0x2a   : > { %s1136_s26 = scalar_lea.vmem %s1472_s7, 896  ;;  %p1144_p2 = scmp.lt.s32.totalorder %s1472_s7, %s1472_s7 }
  0x2b   : > { %p1137_p9 = scmp.ne.s32.totalorder %s1472_s7, %s1136_s26  ;;  %p1145_p6 = scmp.lt.s32.totalorder %s1136_s26, %s1136_s26 }
  0x2d   : > { %p1139_p10 = pnand %p1137_p9, %p1495_p13  ;;  %p1146_p12 = por %p1145_p6, %p1144_p2 }
  0x2f   : > { %p1140_p1 = pneg %p1139_p10 }
  0x31   : > { %p1147_p0 = pnand %p1146_p12, %p1140_p1 }
  0x33   : > { %1150 = shalt.err (!%p1147_p0)
}
  0x34   : > { %s1897_s30 = smov 128   ;;  %s1899_s9 = smov 8  }
  0x35   : > { %1048 = dma.hbm_to_vmem [thread:$0]  (!%p1479_p11), %s1909_s2, 896, %s1472_s7, [#allocation6], %s1897_s30, %s1897_s30, %s1899_s9  }
  0x36   : > { %s1911_s3 = sld [smem:[#allocation23_spill]] }
  0x3c   : > { %s1151_s16 = scalar_lea.hbm %s1911_s3, 896 }
  0x3d   : > { %p1152_p1 = scmp.ne.s32.totalorder %s1911_s3, %s1151_s16  ;;  %p1158_p10 = scmp.lt.u32.totalorder %s1151_s16, %s1911_s3 }
  0x3f   : > { %p1154_p2 = pnand %p1152_p1, %p1495_p13 }
  0x41   : > { %p1155_p6 = pneg %p1154_p2 }
  0x43   : > { %p1160_p3 = pnand %p1158_p10, %p1155_p6 }
  0x45   : > { %1163 = shalt.err (!%p1160_p3)
}
  0x46   : > { %s1164_s7 = scalar_lea.vmem %s1483_s10, 896  ;;  %p1172_p12 = scmp.lt.s32.totalorder %s1483_s10, %s1483_s10 }
  0x47   : > { %p1165_p5 = scmp.ne.s32.totalorder %s1483_s10, %s1164_s7  ;;  %p1173_p0 = scmp.lt.s32.totalorder %s1164_s7, %s1164_s7 }
  0x49   : > { %p1167_p7 = pnand %p1165_p5, %p1495_p13  ;;  %p1174_p1 = por %p1173_p0, %p1172_p12 }
  0x4b   : > { %p1168_p9 = pneg %p1167_p7 }
  0x4d   : > { %p1175_p2 = pnand %p1174_p1, %p1168_p9 }
  0x4f   : > { %1178 = shalt.err (!%p1175_p2)
}
  0x50   : > { %1051 = dma.hbm_to_vmem [thread:$0]  (!%p1479_p11), %s1911_s3, 896, %s1483_s10, [#allocation9], %s1897_s30, %s1897_s30, %s1899_s9  }
  0x51   : > { %s1912_s4 = sld [smem:[#allocation24_spill]] }
  0x57   : > { %s1179_s16 = scalar_lea.hbm %s1912_s4, 896 }
  0x58   : > { %p1180_p6 = scmp.ne.s32.totalorder %s1912_s4, %s1179_s16  ;;  %p1186_p5 = scmp.lt.u32.totalorder %s1179_s16, %s1912_s4 }
  0x5a   : > { %p1182_p10 = pnand %p1180_p6, %p1495_p13 }
  0x5c   : > { %p1183_p3 = pneg %p1182_p10 }
  0x5e   : > { %p1188_p7 = pnand %p1186_p5, %p1183_p3 }
  0x60   : > { %1191 = shalt.err (!%p1188_p7)
}
  0x61   : > { %s1192_s7 = scalar_lea.vmem %s241_s12, 896  ;;  %p1200_p1 = scmp.lt.s32.totalorder %s241_s12, %s241_s12 }
  0x62   : > { %p1193_p9 = scmp.ne.s32.totalorder %s241_s12, %s1192_s7  ;;  %p1201_p2 = scmp.lt.s32.totalorder %s1192_s7, %s1192_s7 }
  0x64   : > { %p1195_p12 = pnand %p1193_p9, %p1495_p13  ;;  %p1202_p4 = por %p1201_p2, %p1200_p1 }
  0x66   : > { %p1196_p0 = pneg %p1195_p12 }
  0x68   : > { %p1203_p8 = pnand %p1202_p4, %p1196_p0 }
  0x6a   : > { %1206 = shalt.err (!%p1203_p8)
}
  0x6b   : > { %1054 = dma.hbm_to_vmem [thread:$0]  (!%p1479_p11), %s1912_s4, 896, %s241_s12, [#allocation9], %s1897_s30, %s1897_s30, %s1899_s9  }
  0x6c   : > { %s1568_s18 = sadd.s32 1, %s1377_s24   ;;  %s37_s13 = sadd.s32 1, %s1373_s23 }
  0x6d   : > { %s34_s8 = ssub.s32 %s1377_s24, %s1568_s18  ;;  %p44_p8 = scmp.ne.s32.totalorder %s1373_s23, %s1369_s22 }
  0x6e   : > { %p35_p4 = scmp.eq.s32.totalorder %s34_s8, 0  ;;  %p45_p13 = scmp.eq.s32.totalorder %s1377_s24, 0 }
  0x6f   : > { %p1072_p6 = scmp.lt.s32.totalorder %s1377_s24, 2  ;;  %p1914_p3 = scmp.eq.s32.totalorder %s1449_s25, 1 }
  0x70   : > { %s1578_s14 = scalar_select %p35_p4, %s1373_s23, %s37_s13  }
  0x71   : > { %p46_p10 = por %p45_p13, %p44_p8  ;;  %p1582_p5 = por %p1914_p3, %p44_p8 }
  0x72   : > { %1913 = sst [smem:[#allocation20_spill]] %s1578_s14  ;;  %s254_s16 = sand.u32 1, %s1373_s23  }
  0x73   : > { %s917_s17 = sshll.u32 %s1377_s24, 9  ;;  %s1588_s12 = sshll.u32 %s254_s16, 5 }
  0x74   : > { %s1916_s0 = sld [smem:[#allocation21_spill]]  ;;  %s258_s7 = scalar_lea.vmem [#allocation2], %s1588_s12 }
  0x75   : > { %s265_s10 = sshll.u32 %s258_s7, 4  ;;  %p1596_p11 = pnand %p1072_p6, %p46_p10  ;;  %s1600_s10 = int_to_ptr.vmem [resolvable:$true] %s265_s10 }
  0x76   : > { %s1605_s19 = scalar_lea.hbm %s1888_s1, %s917_s17  ;;  %s1607_s20 = scalar_lea.sflag [#allocation3], %s254_s16 }
  0x77   : > { %p1209_p9 = pneg %p1596_p11 }
  0x7a   : > { %s1593_s26 = scalar_lea.hbm %s1916_s0, %s917_s17  ;;  %s1212_s2 = scalar_lea.hbm %s1916_s0, 1024 }
  0x7b   : > { %s1207_s30 = scalar_lea.hbm %s1593_s26, 512  ;;  %p1213_p1 = scmp.lt.u32.totalorder %s1593_s26, %s1916_s0 }
  0x7c   : > { %p1208_p7 = scmp.ne.s32.totalorder %s1593_s26, %s1207_s30  ;;  %p1214_p2 = scmp.lt.u32.totalorder %s1212_s2, %s1207_s30 }
  0x7d   : > { %p1216_p8 = scmp.lt.u32.totalorder %s1207_s30, %s1593_s26 }
  0x7e   : > { %p1210_p12 = pnand %p1209_p9, %p1208_p7  ;;  %p1215_p4 = por %p1214_p2, %p1213_p1 }
  0x80   : > { %p1211_p0 = pneg %p1210_p12  ;;  %p1217_p13 = por %p1216_p8, %p1215_p4 }
  0x82   : > { %p1218_p6 = pnand %p1217_p13, %p1211_p0 }
  0x84   : > { %1221 = shalt.err (!%p1218_p6)
}
  0x85   : > { %s1222_s16 = scalar_lea.vmem %s1600_s10, 512  ;;  %s1384_s9 = smov [#allocation2]  }
  0x86   : > { %p1223_p10 = scmp.ne.s32.totalorder %s1600_s10, %s1222_s16  ;;  %s1227_s17 = sshll.u32 %s1384_s9, 4  ;;  %s1228_s17 = int_to_ptr.vmem [resolvable:$false] %s1227_s17 }
  0x87   : > { %s1229_s3 = scalar_lea.vmem %s1228_s17, 1024  ;;  %p1230_p12 = scmp.lt.s32.totalorder %s1600_s10, %s1228_s17 }
  0x88   : > { %p1225_p3 = pnand %p1223_p10, %p1209_p9  ;;  %p1231_p1 = scmp.lt.s32.totalorder %s1229_s3, %s1222_s16 }
  0x8a   : > { %p1226_p7 = pneg %p1225_p3  ;;  %p1232_p2 = por %p1231_p1, %p1230_p12 }
  0x8c   : > { %p1233_p4 = pnand %p1232_p2, %p1226_p7 }
  0x8e   : > { %1236 = shalt.err (!%p1233_p4)
}
  0x8f   : > { %s1918_s2 = smov 8   ;;  %s1919_s4 = smov 128  }
  0x90   : > { %1058 = dma.hbm_to_vmem [thread:$0]  (!%p1596_p11), %s1593_s26, 512, %s1600_s10, %s1607_s20, %s1919_s4, %s1919_s4, %s1918_s2  }
  0x91   : > { %s279_s30 = scalar_lea.vmem [#allocation5], %s1588_s12  ;;  %s275_s13 = sand.u32 1, %s1377_s24  }
  0x92   : > { %s286_s8 = sshll.u32 %s279_s30, 4  ;;  %s1642_s7 = scalar_lea.sflag [#allocation6], %s275_s13  ;;  %s1640_s8 = int_to_ptr.vmem [resolvable:$true] %s286_s8 }
  0x93   : > { %s1237_s16 = scalar_lea.hbm %s1605_s19, 512  ;;  %s1242_s3 = scalar_lea.hbm %s1888_s1, 1024 }
  0x94   : > { %p1238_p0 = scmp.ne.s32.totalorder %s1605_s19, %s1237_s16  ;;  %p1243_p6 = scmp.lt.u32.totalorder %s1605_s19, %s1888_s1 }
  0x95   : > { %p1244_p10 = scmp.lt.u32.totalorder %s1242_s3, %s1237_s16  ;;  %p1246_p7 = scmp.lt.u32.totalorder %s1237_s16, %s1605_s19 }
  0x96   : > { %p1240_p8 = pnand %p1238_p0, %p1209_p9 }
  0x97   : > { %p1245_p3 = por %p1244_p10, %p1243_p6 }
  0x98   : > { %p1241_p13 = pneg %p1240_p8 }
  0x99   : > { %p1247_p12 = por %p1246_p7, %p1245_p3 }
  0x9b   : > { %p1248_p1 = pnand %p1247_p12, %p1241_p13 }
  0x9d   : > { %1251 = shalt.err (!%p1248_p1)
}
  0x9e   : > { %s1252_s12 = scalar_lea.vmem %s1640_s8, 512  ;;  %s1385_s26 = smov [#allocation5]  }
  0x9f   : > { %p1253_p2 = scmp.ne.s32.totalorder %s1640_s8, %s1252_s12  ;;  %s1257_s10 = sshll.u32 %s1385_s26, 4  ;;  %s1258_s10 = int_to_ptr.vmem [resolvable:$false] %s1257_s10 }
  0xa0   : > { %s1259_s0 = scalar_lea.vmem %s1258_s10, 1024  ;;  %p1260_p8 = scmp.lt.s32.totalorder %s1640_s8, %s1258_s10 }
  0xa1   : > { %p1255_p4 = pnand %p1253_p2, %p1209_p9  ;;  %p1261_p6 = scmp.lt.s32.totalorder %s1259_s0, %s1252_s12 }
  0xa3   : > { %p1256_p0 = pneg %p1255_p4  ;;  %p1262_p10 = por %p1261_p6, %p1260_p8 }
  0xa5   : > { %p1263_p3 = pnand %p1262_p10, %p1256_p0 }
  0xa7   : > { %1266 = shalt.err (!%p1263_p3)
}
  0xa8   : > { %1061 = dma.hbm_to_vmem [thread:$0]  (!%p1596_p11), %s1605_s19, 512, %s1640_s8, %s1642_s7, %s1919_s4, %s1919_s4, %s1918_s2  }
  0xa9   : > { %p1920_p9 = scmp.ne.s32.totalorder %s1907_s29, 0 }
  0xaa   : > { %s1674_s14 = sand.u32 (!%p1920_p9), 1, %s1369_s22   ;;  %p1921_p13 = scmp.ne.s32.totalorder (!%p1920_p9), %s1905_s27, 0 }
  0xab   : > { %298 = sbr.rel (%p1920_p9) target bundleno = 728 (0x2d8), region = 40  ;;  %s1677_s20 = sshll.u32 (!%p1920_p9), %s1674_s14, 5 }
  0xac   : > { %s301_s11 = scalar_lea.sflag (!%p1920_p9), [#allocation3], %s1674_s14  ;;  %s1681_s30 = scalar_lea.vmem (!%p1920_p9), [#allocation2], %s1677_s20 }
  0xb2   : > { %1340 = dma.done.wait (%p1921_p13), %s301_s11, 512  }
  0xb3   : > { %1342 = vsyncadd (%p1921_p13), %s301_s11, 4294966784  ;;  %s309_s29 = sand.u32 1, %s1449_s25   ;;  %s1689_s2 = scalar_lea.vmem [#allocation5], %s1677_s20 }
  0xb4   : > { %s310_s19 = scalar_lea.sflag [#allocation6], %s309_s29 }
  0xb5   : > { %1344 = dma.done.wait (%p1921_p13), %s310_s19, 512  }
  0xb6   : > { %1346 = vsyncadd (%p1921_p13), %s310_s19, 4294966784  ;;  %p1922_p11 = scmp.eq.s32.totalorder %s1449_s25, 0 }
  0xb8   : > { %1348 = dma.done.wait (%p1922_p11), [#allocation6], 896   ;;  %p1923_p7 = pmov %p1922_p11 }
  0xba   : > { %1350 = vsyncadd (%p1923_p7), [#allocation6], 4294966400  ;;  %p1924_p12 = pmov %p1923_p7 }
  0xbb   : > { %p1925_p1 = pmov %p1923_p7 }
  0xbc   : > { %1352 = dma.done.wait (%p1924_p12), [#allocation9], 1792  }
  0xbd   : > { %1354 = vsyncadd (%p1925_p1), [#allocation9], 4294965504  ;;  %v1386_v0 = vmov 0.0|0.0   ;;  %vm1387_vm0 = vmmov 0   ;;  %v1388_v1 = vmov 0.0   ;;  %v406_v2 = vld [vmem:[#allocation8] sm:$0xff] }
  0xbe   : > { %996 = vmatprep.subr.bf16.mxu0 %v1386_v0  ;;  %959 = vmatprep.mubr.msk.f32.mxu0 %vm1387_vm0, %v1388_v1  ;;  %v407_v3 = vld [vmem:[#allocation8 + $0x8] sm:$0xff]  ;;  %v408_v4 = vld [vmem:[#allocation8 + $0x10] sm:$0xff]  ;;  %v409_v6 = vld [vmem:[#allocation8 + $0x18] sm:$0xff]  ;;  %vm372_vm1 = vcmask 400384   ;;  %vm416_vm2 = vcmask 1040384   ;;  %s919_s27 = sshll.u32 %s1449_s25, 9 }
  0xbf   : > { %1014 = vmatprep.subr.bf16.mxu1 %v1386_v0  ;;  %993 = vmatprep.mubr.msk.f32.mxu1 %vm1387_vm0, %v1388_v1  ;;  %v997_v5 = vpack.c.bf16 %v407_v3, %v406_v2  ;;  %v410_v7 = vld [vmem:[#allocation8 + $0x20] sm:$0xff]  ;;  %v411_v8 = vld [vmem:[#allocation8 + $0x28] sm:$0xff]  ;;  %v1713_v10 = vld [vmem:[%s1681_s30 + $0x8] sm:$0xff]  ;;  %v1000_v11 = vpack.c.bf16 %v409_v6, %v408_v4  ;;  %s356_s4 = scalar_lea.vmem [#allocation11], %s1677_s20  ;;  %s1784_s16 = scalar_lea.hbm %s1892_s5, %s919_s27 }
  0xc0   : > { %v1710_v9 = vld [vmem:[%s1681_s30] sm:$0xff]  ;;  %v1716_v12 = vld [vmem:[%s1681_s30 + $0x10] sm:$0xff]  ;;  %v1719_v13 = vld [vmem:[%s1681_s30 + $0x18] sm:$0xff]  ;;  %v374_v16 = vsel %vm372_vm1, %v1713_v10, 0.0  ;;  %v1003_v26 = vpack.c.bf16 %v411_v8, %v410_v7  ;;  %s711_s8 = sshll.u32 %s356_s4, 4  ;;  %s1787_s25 = scalar_lea.vmem [#allocation12], %s1677_s20  ;;  %s1794_s8 = int_to_ptr.vmem [resolvable:$true] %s711_s8 }
  0xc1   : > { %998 = vmatpush3.bf16.msra.mxu0 %v997_v5  ;;  %v1722_v14 = vld [vmem:[%s1689_s2] sm:$0xff]  ;;  %v373_v15 = vsel %vm372_vm1, %v1710_v9, 0.0  ;;  %v1730_v17 = vld [vmem:[%s1689_s2 + $0x8] sm:$0xff]  ;;  %v1733_v18 = vld [vmem:[%s1689_s2 + $0x10] sm:$0xff]  ;;  %v376_v22 = vsel %vm372_vm1, %v1716_v12, 0.0  ;;  %v378_v29 = vsel %vm372_vm1, %v1719_v13, 0.0  ;;  %s1799_s12 = scalar_lea.hbm %s1893_s6, %s919_s27 }
  0xc2   : > { %999 = vmatprep.subr.bf16.mxu0 %v1386_v0  ;;  %v1736_v19 = vld [vmem:[%s1689_s2 + $0x18] sm:$0xff]  ;;  %v386_v20 = vsel %vm372_vm1, %v1722_v14, 0.0  ;;  %v375_v21 = vadd.f32 %v374_v16, %v373_v15  ;;  %v387_v23 = vsel %vm372_vm1, %v1730_v17, 0.0  ;;  %v389_v24 = vsel %vm372_vm1, %v1733_v18, 0.0  ;;  %v567_v30 = vld [vmem:[#allocation10] sm:$0xff]  ;;  %v569_v34 = vld [vmem:[#allocation10 + $0x10] sm:$0xff] }
  0xc3   : > { %v388_v25 = vadd.f32 %v387_v23, %v386_v20  ;;  %v391_v27 = vsel %vm372_vm1, %v1736_v19, 0.0  ;;  %v568_v31 = vld [vmem:[#allocation10 + $0x8] sm:$0xff]  ;;  %v570_v35 = vld [vmem:[#allocation10 + $0x18] sm:$0xff]  ;;  %v571_v39 = vld [vmem:[#allocation10 + $0x20] sm:$0xff]  ;;  %v660_v16 = vlaneseq  ;;  %v657_v23 = vsub.f32 %v1713_v10, %v1730_v17  ;;  %s727_s9 = sshll.u32 %s1787_s25, 4  ;;  %s693_s26 = scalar_lea.sflag [#allocation4], %s1674_s14  ;;  %s1801_s9 = int_to_ptr.vmem [resolvable:$true] %s727_s9 }
  0xc4   : > { %v377_v28 = vadd.f32 %v376_v22, %v375_v21  ;;  %v1015_v33 = vpack.c.bf16 %v568_v31, %v567_v30  ;;  %v1018_v38 = vpack.c.bf16 %v570_v35, %v569_v34  ;;  %v572_v40 = vld [vmem:[#allocation10 + $0x28] sm:$0xff]  ;;  %v412_v41 = vld [vmem:[#allocation8 + $0x30] sm:$0x1]  ;;  %v399_v48 = vld [vmem:[#allocation7] sm:$0xff]  ;;  %v656_v22 = vsub.f32 %v1710_v9, %v1722_v14  ;;  %s1267_s10 = scalar_lea.vmem %s1794_s8, 512  ;;  %s1389_s0 = smov [#allocation11]  }
  0xc5   : > { %1001 = vmatpush3.bf16.msra.mxu0 %v1000_v11  ;;  %v390_v32 = vadd.f32 %v389_v24, %v388_v25  ;;  %v1021_v45 = vpack.c.bf16 %v572_v40, %v571_v39  ;;  %v400_v49 = vld [vmem:[#allocation7 + $0x8] sm:$0xff]  ;;  %v401_v54 = vld [vmem:[#allocation7 + $0x10] sm:$0xff]  ;;  %v402_v55 = vld [vmem:[#allocation7 + $0x18] sm:$0xff]  ;;  %v661_v20 = vshrl.u32 %v660_v16, 7  ;;  %v658_v24 = vsub.f32 %v1716_v12, %v1733_v18  ;;  %p1268_p2 = scmp.ne.s32.totalorder %s1794_s8, %s1267_s10  ;;  %s1271_s20 = sshll.u32 %s1389_s0, 4  ;;  %s1272_s20 = int_to_ptr.vmem [resolvable:$false] %s1271_s20 }
  0xc6   : > { %1002 = vmatprep.subr.bf16.mxu0 %v1386_v0  ;;  %v379_v37 = vadd.f32 %v378_v29, %v377_v28  ;;  %1016 = vmatpush3.bf16.msra.mxu1 %v1015_v33  ;;  %v1006_v52 = vpack.c.bf16 %v400_v49, %v399_v48  ;;  %v1009_v57 = vpack.c.bf16 %v402_v55, %v401_v54  ;;  %v403_v58 = vld [vmem:[#allocation7 + $0x20] sm:$0xff]  ;;  %v404_v59 = vld [vmem:[#allocation7 + $0x28] sm:$0xff]  ;;  %v405_v63 = vld [vmem:[#allocation7 + $0x30] sm:$0x1]  ;;  %s1273_s11 = scalar_lea.vmem %s1272_s20, 1024  ;;  %p1274_p8 = scmp.lt.s32.totalorder %s1794_s8, %s1272_s20 }
  0xc7   : > { %v392_v36 = vadd.f32 %v391_v27, %v390_v32  ;;  %1017 = vmatprep.subr.bf16.mxu1 %v1386_v0  ;;  %v1012_v61 = vpack.c.bf16 %v404_v59, %v403_v58  ;;  %v573_v3 = vld [vmem:[#allocation10 + $0x30] sm:$0x1]  ;;  %v662_v21 = vsub.s32 0, %v661_v20  ;;  %v659_v25 = vsub.f32 %v1719_v13, %v1736_v19  ;;  %p1269_p4 = pnand %p1268_p2, %p1582_p5  ;;  %p1275_p6 = scmp.lt.s32.totalorder %s1273_s11, %s1267_s10 }
  0xc8   : > { %v380_v44 = vrot.slane %v379_v37, 4 }
  0xc9   : > { %1004 = vmatpush3.bf16.msra.mxu0 %v1003_v26  ;;  %v393_v42 = vrot.slane %v392_v36, 4  ;;  %p1270_p0 = pneg %p1269_p4  ;;  %p1276_p10 = por %p1275_p6, %p1274_p8 }
  0xca   : > { %957 = vmatprep.subr.mxu0 %v1388_v1  ;;  %1019 = vmatpush3.bf16.msra.mxu1 %v1018_v38  ;;  %v381_v50 = vadd.f32 %v380_v44, %v379_v37 }
  0xcb   : > { %v394_v43 = vadd.f32 %v393_v42, %v392_v36  ;;  %1020 = vmatprep.subr.bf16.mxu1 %v1386_v0  ;;  %p1277_p3 = pnand %p1276_p10, %p1270_p0 }
  0xcc   : > { %v382_v56 = vrot.slane %v381_v50, 2 }
  0xcd   : > { %958 = vmatpush3.msk.msra.mxu0 %vm416_vm2, %v412_v41  ;;  %v395_v46 = vrot.slane %v394_v43, 2 }
  0xce   : > { %1005 = vmatprep.subr.bf16.mxu0 %v1386_v0  ;;  %1022 = vmatpush3.bf16.msra.mxu1 %v1021_v45  ;;  %v383_v60 = vadd.f32 %v382_v56, %v381_v50 }
  0xcf   : > { %v396_v47 = vadd.f32 %v395_v46, %v394_v43  ;;  %991 = vmatprep.subr.mxu1 %v1388_v1 }
  0xd0   : > { %v384_v62 = vrot.slane %v383_v60, 1 }
  0xd1   : > { %v397_v51 = vrot.slane %v396_v47, 1 }
  0xd2   : > { %v385_v2 = vadd.f32 %v384_v62, %v383_v60  ;;  %992 = vmatpush3.msk.msra.mxu1 %vm416_vm2, %v573_v3 }
  0xd3   : > { %v398_v53 = vadd.f32 %v397_v51, %v396_v47 }
  0xd5   : > { %960 = vmatmul.mubr.msk.f32.vlgmr.msra.gmra.mrb[0].mxu0 %vm372_vm1, %v398_v53 }
  0xd6   : > { %1007 = vmatpush3.bf16.msra.mxu0 %v1006_v52  ;;  %976 = vmatprep.mubr.msk.f32.mxu0 %vm1387_vm0, %v1388_v1 }
  0xd7   : > { %1008 = vmatprep.subr.bf16.mxu0 %v1386_v0 }
  0xda   : > { %1010 = vmatpush3.bf16.msra.mxu0 %v1009_v57 }
  0xdb   : > { %1011 = vmatprep.subr.bf16.mxu0 %v1386_v0 }
  0xde   : > { %1013 = vmatpush3.bf16.msra.mxu0 %v1012_v61 }
  0xdf   : > { %974 = vmatprep.subr.mxu0 %v1388_v1 }
  0xe2   : > { %975 = vmatpush3.msk.msra.mxu0 %vm416_vm2, %v405_v63 }
  0xe3   : > { %977 = vmatmul.mubr.msk.f32.vlgmr.msra.gmra.mrb[0].mxu0 %vm372_vm1, %v385_v2 }
 0x1b6   : > { %v562_v4 = vpop.f32.mrb[0].mxu0 }
 0x1b7   : > { %v566_v5 = vmax.f32 %v562_v4, 0.0  ;;  %v978_v6 = vpop.f32.mrb[1].mxu0 }
 0x1b9   : > { %994 = vmatmul.mubr.msk.f32.vlgmr.msra.gmra.mrb[0].mxu1 %vm372_vm1, %v566_v5 }
 0x28c   : > { %v646_v7 = vpop.f32.mrb[0].mxu1 }
 0x28d   : > { %v650_v0 = vsub.f32 0.0, %v646_v7  ;;  %v995_v8 = vpop.f32.mrb[1].mxu1 }
 0x28f   : > { %v651_v11 = vmul.f32 1.442695, %v650_v0 }
 0x291   : > { %1119 = vpow2.f32 %v651_v11 }
 0x29b   : > { %v1120_v1 = vpop.eup %1119 }
 0x29c   : > { %v653_v15 = vadd.f32 1.0, %v1120_v1 }
 0x29e   : > { %1121 = vrcp.f32 %v653_v15 }
 0x2a8   : > { %v1122_v26 = vpop.eup %1121 }
 0x2a9   : > { %v663_v27 = vrot.slane %v1122_v26, %v662_v21 }
 0x2ab   : > { %v664_v28 = vmul.f32 %v663_v27, %v656_v22  ;;  %v665_v29 = vmul.f32 %v663_v27, %v657_v23  ;;  %v666_v30 = vmul.f32 %v663_v27, %v658_v24  ;;  %v667_v31 = vmul.f32 %v663_v27, %v659_v25 }
 0x2ad   : > { %v668_v32 = vadd.f32 %v664_v28, %v1722_v14  ;;  %v669_v33 = vadd.f32 %v665_v29, %v1730_v17  ;;  %v670_v34 = vadd.f32 %v666_v30, %v1733_v18  ;;  %v671_v35 = vadd.f32 %v667_v31, %v1736_v19 }
 0x2ae   : > { %v680_v36 = vsub.f32 %v1710_v9, %v664_v28  ;;  %v681_v37 = vsub.f32 %v1713_v10, %v665_v29  ;;  %v682_v14 = vsub.f32 %v1716_v12, %v666_v30  ;;  %v683_v17 = vsub.f32 %v1719_v13, %v667_v31 }
 0x2af   : > { %v672_v18 = vmax.f32 %v668_v32, 0.0  ;;  %v673_v19 = vmax.f32 %v669_v33, 0.0  ;;  %v674_v38 = vmax.f32 %v670_v34, 0.0  ;;  %v675_v39 = vmax.f32 %v671_v35, 0.0 }
 0x2b0   : > { %v684_v40 = vmax.f32 %v680_v36, 0.0  ;;  %v685_v41 = vmax.f32 %v681_v37, 0.0  ;;  %v686_v42 = vmax.f32 %v682_v14, 0.0  ;;  %v687_v9 = vmax.f32 %v683_v17, 0.0 }
 0x2b1   : > { %676 = vst.msk [vmem:[%s356_s4] sm:$0xff] %vm372_vm1, %v672_v18  ;;  %677 = vst.msk [vmem:[%s356_s4 + $0x8] sm:$0xff] %vm372_vm1, %v673_v19 }
 0x2b2   : > { %678 = vst.msk [vmem:[%s356_s4 + $0x10] sm:$0xff] %vm372_vm1, %v674_v38  ;;  %679 = vst.msk [vmem:[%s356_s4 + $0x18] sm:$0xff] %vm372_vm1, %v675_v39 }
 0x2b3   : > { %1280 = shalt.err (!%p1277_p3)
}
 0x2b4   : > { %s1281_s30 = scalar_lea.hbm %s1784_s16, 512  ;;  %s1285_s2 = scalar_lea.hbm %s1892_s5, 1024 }
 0x2b5   : > { %p1282_p9 = scmp.ne.s32.totalorder %s1784_s16, %s1281_s30  ;;  %p1286_p7 = scmp.lt.u32.totalorder %s1784_s16, %s1892_s5 }
 0x2b6   : > { %p1287_p12 = scmp.lt.u32.totalorder %s1285_s2, %s1281_s30  ;;  %p1289_p2 = scmp.lt.u32.totalorder %s1281_s30, %s1784_s16 }
 0x2b7   : > { %p1283_p13 = pnand %p1282_p9, %p1582_p5 }
 0x2b8   : > { %p1288_p1 = por %p1287_p12, %p1286_p7 }
 0x2b9   : > { %p1284_p11 = pneg %p1283_p13 }
 0x2ba   : > { %p1290_p4 = por %p1289_p2, %p1288_p1 }
 0x2bc   : > { %p1291_p0 = pnand %p1290_p4, %p1284_p11 }
 0x2be   : > { %1294 = shalt.err (!%p1291_p0)
}
 0x2bf   : > { %s1390_s13 = smov 128   ;;  %s1391_s7 = smov 8   ;;  %688 = vst.msk [vmem:[%s1787_s25] sm:$0xff] %vm372_vm1, %v684_v40  ;;  %689 = vst.msk [vmem:[%s1787_s25 + $0x8] sm:$0xff] %vm372_vm1, %v685_v41 }
 0x2c0   : > { %1041 = dma.vmem_to_hbm [thread:$0]  (%p1582_p5), %s1794_s8, 512, %s1784_s16, %s693_s26, %s1390_s13, %s1390_s13, %s1391_s7  }
 0x2c1   : > { %690 = vst.msk [vmem:[%s1787_s25 + $0x10] sm:$0xff] %vm372_vm1, %v686_v42  ;;  %691 = vst.msk [vmem:[%s1787_s25 + $0x18] sm:$0xff] %vm372_vm1, %v687_v9  ;;  %s698_s17 = scalar_lea.sflag [#allocation13], %s1674_s14  ;;  %s1295_s3 = scalar_lea.vmem %s1801_s9, 512 }
 0x2c2   : > { %p1296_p8 = scmp.ne.s32.totalorder %s1801_s9, %s1295_s3  ;;  %s1392_s10 = smov [#allocation12]  }
 0x2c3   : > { %s1299_s0 = sshll.u32 %s1392_s10, 4  ;;  %s1300_s0 = int_to_ptr.vmem [resolvable:$false] %s1299_s0 }
 0x2c4   : > { %p1297_p6 = pnand %p1296_p8, %p1582_p5  ;;  %s1301_s20 = scalar_lea.vmem %s1300_s0, 1024 }
 0x2c5   : > { %p1302_p3 = scmp.lt.s32.totalorder %s1801_s9, %s1300_s0  ;;  %p1303_p9 = scmp.lt.s32.totalorder %s1301_s20, %s1295_s3 }
 0x2c6   : > { %p1298_p10 = pneg %p1297_p6 }
 0x2c7   : > { %p1304_p13 = por %p1303_p9, %p1302_p3 }
 0x2c9   : > { %p1305_p11 = pnand %p1304_p13, %p1298_p10 }
 0x2cb   : > { %1308 = shalt.err (!%p1305_p11)
}
 0x2cc   : > { %s1309_s8 = scalar_lea.hbm %s1799_s12, 512  ;;  %s1313_s26 = scalar_lea.hbm %s1893_s6, 1024 }
 0x2cd   : > { %p1310_p7 = scmp.ne.s32.totalorder %s1799_s12, %s1309_s8  ;;  %p1314_p2 = scmp.lt.u32.totalorder %s1799_s12, %s1893_s6 }
 0x2ce   : > { %p1315_p4 = scmp.lt.u32.totalorder %s1313_s26, %s1309_s8  ;;  %p1317_p8 = scmp.lt.u32.totalorder %s1309_s8, %s1799_s12 }
 0x2cf   : > { %p1311_p12 = pnand %p1310_p7, %p1582_p5 }
 0x2d0   : > { %p1316_p0 = por %p1315_p4, %p1314_p2 }
 0x2d1   : > { %p1312_p1 = pneg %p1311_p12 }
 0x2d2   : > { %p1318_p6 = por %p1317_p8, %p1316_p0 }
 0x2d4   : > { %p1319_p10 = pnand %p1318_p6, %p1312_p1 }
 0x2d6   : > { %1322 = shalt.err (!%p1319_p10)
}
 0x2d7   : > { %1042 = dma.vmem_to_hbm [thread:$0]  (%p1582_p5), %s1801_s9, 512, %s1799_s12, %s698_s17, %s1390_s13, %s1390_s13, %s1391_s7  }
 0x2d8 PF: > { %s742_s29 = sand.u32 1, %s1365_s21   ;;  %p1926_p3 = scmp.ne.s32.totalorder %s1906_s28, 0 }
 0x2d9   : > { %p1927_p9 = scmp.ge.s32.totalorder %s1377_s24, 2  ;;  %s743_s19 = scalar_lea.sflag [#allocation4], %s742_s29 }
 0x2db   : > { %p1063_p13 = pnand %p1927_p9, %p1926_p3 }
 0x2dd   : > { %1356 = dma.done.wait (!%p1063_p13), %s743_s19, 512  }
 0x2de   : > { %1358 = vsyncadd (!%p1063_p13), %s743_s19, 4294966784  ;;  %s752_s15 = scalar_lea.sflag [#allocation13], %s742_s29 }
 0x2df   : > { %1360 = dma.done.wait (!%p1063_p13), %s752_s15, 512  }
 0x2e0   : > { %1362 = vsyncadd (!%p1063_p13), %s752_s15, 4294966784  ;;  %s1928_s14 = sld [smem:[#allocation20_spill]]  ;;  %p27_p5 = scmp.ge.s32.totalorder %s1568_s18, 4  }
 0x2e1   : > { %s1929_s21 = smov %s1369_s22  ;;  %s1930_s22 = smov %s1373_s23 }
 0x2e2   : > { %s1932_s24 = smov %s1568_s18  ;;  %29 = sbr.rel (!%p27_p5) target bundleno = 15 (0xf), region = 127 }
 0x2e6   : > { %s1931_s23 = smov %s1928_s14 }
 0x2e9   :  { %757 = vsyncpa [#allocation3], 1 }
 0x2ea   :  { %759 = vsyncpa [#allocation3 + $0x1], 1 }
 0x2eb   :  { %760 = vsyncpa [#allocation6], 1 }
 0x2ec   :  { %762 = vsyncpa [#allocation6 + $0x1], 1 }
 0x2ed   :  { %763 = vsyncpa [#allocation9], 1 }
 0x2ee   :  { %764 = vsyncpa [#allocation4], 1 }
 0x2ef   :  { %766 = vsyncpa [#allocation4 + $0x1], 1 }
 0x2f0   :  { %767 = vsyncpa [#allocation13], 1 }
 0x2f1   :  { %769 = vsyncpa [#allocation13 + $0x1], 1 }

</bundles_post_ra>
